<compile_context>
chip_gen: v5e
topology: v5e:2x2
jax: 0.10.0
libtpu: 0.0.40
codegen_flags: <defaults>
</compile_context>

<pallas_src>
import functools

import jax
import jax.numpy as jnp
from jax.experimental import pallas as pl
from jax.experimental.pallas import tpu as pltpu


def _round_up(x, m):
    return ((x + m - 1) // m) * m


# ------------------------------ Pallas kernel -------------------------------

def _time_embedding_kernel(t_ref, inv_ref, w1s_ref, w1c_ref, b1_ref,
                           w2_ref, b2_ref, o_ref):
    """Fused: ang = t * inv_freq; [sin, cos]; Linear; SiLU; Linear."""
    t = t_ref[...].astype(jnp.float32)           # (tb, 1)
    inv = inv_ref[...]                           # (1, Hp) f32
    ang = t * inv                                # (tb, Hp) broadcast in VMEM

    # f32 transcendentals (EUP); accuracy matters for t up to ~1000.
    s = jnp.sin(ang)
    c = jnp.cos(ang)

    # emb @ W1^T == sin(ang) @ W1s + cos(ang) @ W1c  (concat-free).
    # MXU operands in bf16, accumulate in f32.
    h = (jnp.dot(s.astype(jnp.bfloat16), w1s_ref[...],
                 preferred_element_type=jnp.float32)
         + jnp.dot(c.astype(jnp.bfloat16), w1c_ref[...],
                   preferred_element_type=jnp.float32)
         + b1_ref[...])

    # SiLU in f32 (VPU/EUP; v5e has no bf16 elementwise path anyway).
    h = h * jax.nn.sigmoid(h)

    out = (jnp.dot(h.astype(jnp.bfloat16), w2_ref[...],
                   preferred_element_type=jnp.float32)
           + b2_ref[...])
    o_ref[...] = out.astype(o_ref.dtype)


# ------------------------ one-time parameter preparation --------------------

def prepare_time_embedding_params(params, *, time_dim, emb_dim):
    """Transpose / split / zero-pad / bf16-cast the MLP weights ONCE.

    params (PyTorch layout):
      w1: (emb_dim, time_dim), b1: (emb_dim,),
      w2: (emb_dim, emb_dim),  b2: (emb_dim,)
    """
    half = time_dim // 2
    Hp = _round_up(half, 8)          # sublane-aligned only (no 128-lane pad)
    Ep = _round_up(emb_dim, 128)     # lane-dense hidden / output dim
    f32 = jnp.float32
    bf16 = jnp.bfloat16

    # inverse factor: 1 / 10000**(i/half); padded lanes are 0 -> ang = 0,
    # whose cos(0)=1 contribution is killed by the zero-padded w1c rows.
    idx = jnp.arange(half, dtype=f32)
    inv = jnp.zeros((1, Hp), f32).at[0, :half].set(10000.0 ** (-idx / half))

    # Split first Linear into sin-rows / cos-rows, transpose to (K, N), pad,
    # then cast to bf16 (zeros stay exactly zero).
    w1t = params["w1"].astype(f32).T                          # (time_dim, emb)
    w1s = jnp.zeros((Hp, Ep), f32).at[:half, :emb_dim].set(w1t[:half]).astype(bf16)
    w1c = jnp.zeros((Hp, Ep), f32).at[:half, :emb_dim].set(w1t[half:]).astype(bf16)
    b1p = jnp.zeros((1, Ep), f32).at[0, :emb_dim].set(params["b1"].astype(f32))

    w2p = jnp.zeros((Ep, Ep), f32).at[:emb_dim, :emb_dim].set(
        params["w2"].astype(f32).T).astype(bf16)
    b2p = jnp.zeros((1, Ep), f32).at[0, :emb_dim].set(params["b2"].astype(f32))

    return {"inv": inv, "w1s": w1s, "w1c": w1c, "b1": b1p, "w2": w2p, "b2": b2p}


# --------------------------------- wrapper ----------------------------------

@functools.partial(jax.jit, static_argnames=("time_dim", "emb_dim"))
def time_embedding_forward(prepped, time, *, time_dim, emb_dim):
    """time: (B,) float.  Returns (B, emb_dim) float32."""
    half = time_dim // 2
    Hp = _round_up(half, 8)
    Ep = _round_up(emb_dim, 128)
    B = time.shape[0]
    f32 = jnp.float32

    # Batch tiling: up to 512 rows per tile; keep >= 2 grid steps when the
    # batch is large enough so the "parallel" axis covers both v7x TCs.
    rows = _round_up(B, 8)
    tb = min(512, rows)
    if rows > 8 and tb == rows:
        tb = _round_up((rows + 1) // 2, 8)
    Bp = _round_up(rows, tb)

    # time column, zero-padded rows (sliced off at the end)
    t_col = jnp.zeros((Bp, 1), f32).at[:B, 0].set(time.astype(f32))

    # VMEM budget estimate (double-buffered worst case) -> explicit limit so
    # larger configs stay inside v7x's 64 MiB physical VMEM.
    est = 2 * (2 * Hp * Ep * 2          # w1s + w1c (bf16)
               + Ep * Ep * 2            # w2 (bf16)
               + 2 * Ep * 4 + Hp * 4    # biases + inv (f32)
               + tb * Ep * 4 + tb * 4)  # output tile + time tile (f32)
    vmem_limit = int(min(max(est + (4 << 20), 32 << 20), 100 << 20))

    grid = (Bp // tb,)
    out = pl.pallas_call(
        _time_embedding_kernel,
        out_shape=jax.ShapeDtypeStruct((Bp, Ep), f32),
        grid=grid,
        in_specs=[
            pl.BlockSpec((tb, 1), lambda i: (i, 0)),     # time column
            pl.BlockSpec((1, Hp), lambda i: (0, 0)),     # 1/factor
            pl.BlockSpec((Hp, Ep), lambda i: (0, 0)),    # W1 sin-half (bf16)
            pl.BlockSpec((Hp, Ep), lambda i: (0, 0)),    # W1 cos-half (bf16)
            pl.BlockSpec((1, Ep), lambda i: (0, 0)),     # b1
            pl.BlockSpec((Ep, Ep), lambda i: (0, 0)),    # W2 (bf16)
            pl.BlockSpec((1, Ep), lambda i: (0, 0)),     # b2
        ],
        out_specs=pl.BlockSpec((tb, Ep), lambda i: (i, 0)),
        compiler_params=pltpu.CompilerParams(
            dimension_semantics=("parallel",),
            vmem_limit_bytes=vmem_limit),
    )(t_col, prepped["inv"], prepped["w1s"], prepped["w1c"],
      prepped["b1"], prepped["w2"], prepped["b2"])

    return out[:B, :emb_dim]


# ------------------------------ pure-JAX references --------------------------

def time_embedding_reference(params, time, *, time_dim, emb_dim):
    """Exact module semantics, all f32."""
    half = time_dim // 2
    factor = 10000.0 ** (jnp.arange(half, dtype=jnp.float32) / half)
    ang = time.astype(jnp.float32)[:, None] / factor
    emb = jnp.concatenate([jnp.sin(ang), jnp.cos(ang)], axis=-1)
    h = emb @ params["w1"].T + params["b1"]
    h = h * jax.nn.sigmoid(h)
    return h @ params["w2"].T + params["b2"]


def time_embedding_reference_bf16(params, time, *, time_dim, emb_dim):
    """Reference with the same bf16 quantization points as the kernel."""
    bf16, f32 = jnp.bfloat16, jnp.float32
    half = time_dim // 2
    factor = 10000.0 ** (jnp.arange(half, dtype=f32) / half)
    ang = time.astype(f32)[:, None] / factor
    emb = jnp.concatenate([jnp.sin(ang), jnp.cos(ang)], axis=-1).astype(bf16)
    w1 = params["w1"].astype(bf16)
    h = jnp.dot(emb, w1.T, preferred_element_type=f32) + params["b1"].astype(f32)
    h = h * jax.nn.sigmoid(h)
    w2 = params["w2"].astype(bf16)
    return (jnp.dot(h.astype(bf16), w2.T, preferred_element_type=f32)
            + params["b2"].astype(f32))


# ----------------------------------- main ------------------------------------

if __name__ == "__main__":
    B, time_dim, emb_dim = 2, 32, 128

    key = jax.random.PRNGKey(0)
    kt, k1, k2, k3, k4 = jax.random.split(key, 5)

    # diffusion-style timesteps in [0, 1000)
    time = jax.random.uniform(kt, (B,), jnp.float32, 0.0, 1000.0)

    params = {
        "w1": 0.1 * jax.random.normal(k1, (emb_dim, time_dim), jnp.float32),
        "b1": 0.1 * jax.random.normal(k2, (emb_dim,), jnp.float32),
        "w2": 0.1 * jax.random.normal(k3, (emb_dim, emb_dim), jnp.float32),
        "b2": 0.1 * jax.random.normal(k4, (emb_dim,), jnp.float32),
    }

    # One-time weight prep (transpose / pad / bf16) -- hoisted out of the
    # per-call path.
    prepped = jax.tree_util.tree_map(
        jax.block_until_ready,
        prepare_time_embedding_params(params, time_dim=time_dim, emb_dim=emb_dim))

    out = time_embedding_forward(prepped, time, time_dim=time_dim,
                                 emb_dim=emb_dim)
    out = jax.block_until_ready(out)

    ref_f32 = time_embedding_reference(params, time, time_dim=time_dim,
                                       emb_dim=emb_dim)
    ref_bf16 = time_embedding_reference_bf16(params, time, time_dim=time_dim,
                                             emb_dim=emb_dim)

    assert out.shape == (B, emb_dim), out.shape
    assert bool(jnp.all(jnp.isfinite(out)))
    # Tight check vs. a reference with identical bf16 quantization points.
    assert bool(jnp.allclose(out, ref_bf16, atol=5e-4, rtol=5e-4)), \
        float(jnp.max(jnp.abs(out - ref_bf16)))
    # Loose check vs. the exact f32 module semantics (gap = bf16 weight quant).
    assert bool(jnp.allclose(out, ref_f32, atol=5e-2, rtol=5e-2)), \
        float(jnp.max(jnp.abs(out - ref_f32)))
    print("KERNEL_OK")
</pallas_src>

<mosaic_0001>
module attributes {stable_mosaic.version = 11 : i64} {
  func.func @_time_embedding_kernel(%arg0: i32, %arg1: memref<8x1xf32, #tpu.memory_space<vmem>>, %arg2: memref<1x16xf32, #tpu.memory_space<vmem>>, %arg3: memref<16x128xbf16, #tpu.memory_space<vmem>>, %arg4: memref<16x128xbf16, #tpu.memory_space<vmem>>, %arg5: memref<1x128xf32, #tpu.memory_space<vmem>>, %arg6: memref<128x128xbf16, #tpu.memory_space<vmem>>, %arg7: memref<1x128xf32, #tpu.memory_space<vmem>>, %arg8: memref<8x128xf32, #tpu.memory_space<vmem>>) attributes {dimension_semantics = [#tpu.dimension_semantics<parallel>], iteration_bounds = array<i64: 1>, scalar_prefetch = 0 : i64, scratch_operands = 0 : i64, tpu.core_type = #tpu.core_type<tc>, window_params = [{transform_indices = @transform_0, window_bounds = array<i64: 8, 1>}, {pipeline_mode = #tpu.pipeline_mode<synchronous>, transform_indices = @transform_1, window_bounds = array<i64: 1, 16>}, {pipeline_mode = #tpu.pipeline_mode<synchronous>, transform_indices = @transform_2, window_bounds = array<i64: 16, 128>}, {pipeline_mode = #tpu.pipeline_mode<synchronous>, transform_indices = @transform_3, window_bounds = array<i64: 16, 128>}, {pipeline_mode = #tpu.pipeline_mode<synchronous>, transform_indices = @transform_4, window_bounds = array<i64: 1, 128>}, {pipeline_mode = #tpu.pipeline_mode<synchronous>, transform_indices = @transform_5, window_bounds = array<i64: 128, 128>}, {pipeline_mode = #tpu.pipeline_mode<synchronous>, transform_indices = @transform_6, window_bounds = array<i64: 1, 128>}, {transform_indices = @transform_7, window_bounds = array<i64: 8, 128>}]} {
    %c0 = arith.constant 0 : index
    %c0_0 = arith.constant 0 : index
    %0 = vector.load %arg1[%c0, %c0_0] : memref<8x1xf32, #tpu.memory_space<vmem>>, vector<8x1xf32>
    %c0_1 = arith.constant 0 : index
    %c0_2 = arith.constant 0 : index
    %1 = vector.load %arg2[%c0_1, %c0_2] : memref<1x16xf32, #tpu.memory_space<vmem>>, vector<1x16xf32>
    %2 = vector.broadcast %0 : vector<8x1xf32> to vector<8x16xf32>
    %3 = vector.broadcast %1 : vector<1x16xf32> to vector<8x16xf32>
    %4 = arith.mulf %2, %3 : vector<8x16xf32>
    %5 = math.sin %4 : vector<8x16xf32>
    %6 = math.cos %4 : vector<8x16xf32>
    %7 = arith.truncf %5 : vector<8x16xf32> to vector<8x16xbf16>
    %c0_3 = arith.constant 0 : index
    %c0_4 = arith.constant 0 : index
    %8 = vector.load %arg3[%c0_3, %c0_4] : memref<16x128xbf16, #tpu.memory_space<vmem>>, vector<16x128xbf16>
    %cst = arith.constant dense<0.000000e+00> : vector<8x128xf32>
    %9 = tpu.matmul %7, %8, %cst {dimension_numbers = #tpu.dot_dimension_numbers<[1], [0], [0], [1], [0, 0, 1, 1], [], []>} : vector<8x16xbf16>, vector<16x128xbf16>, vector<8x128xf32> -> vector<8x128xf32>
    %10 = arith.truncf %6 : vector<8x16xf32> to vector<8x16xbf16>
    %c0_5 = arith.constant 0 : index
    %c0_6 = arith.constant 0 : index
    %11 = vector.load %arg4[%c0_5, %c0_6] : memref<16x128xbf16, #tpu.memory_space<vmem>>, vector<16x128xbf16>
    %cst_7 = arith.constant dense<0.000000e+00> : vector<8x128xf32>
    %12 = tpu.matmul %10, %11, %cst_7 {dimension_numbers = #tpu.dot_dimension_numbers<[1], [0], [0], [1], [0, 0, 1, 1], [], []>} : vector<8x16xbf16>, vector<16x128xbf16>, vector<8x128xf32> -> vector<8x128xf32>
    %13 = arith.addf %9, %12 : vector<8x128xf32>
    %c0_8 = arith.constant 0 : index
    %c0_9 = arith.constant 0 : index
    %14 = vector.load %arg5[%c0_8, %c0_9] : memref<1x128xf32, #tpu.memory_space<vmem>>, vector<1x128xf32>
    %15 = vector.broadcast %14 : vector<1x128xf32> to vector<8x128xf32>
    %16 = arith.addf %13, %15 : vector<8x128xf32>
    %17 = arith.negf %16 : vector<8x128xf32>
    %18 = math.exp %17 : vector<8x128xf32>
    %cst_10 = arith.constant 1.000000e+00 : f32
    %19 = vector.broadcast %cst_10 : f32 to vector<8x128xf32>
    %20 = arith.addf %19, %18 : vector<8x128xf32>
    %21 = arith.divf %19, %20 : vector<8x128xf32>
    %22 = arith.mulf %16, %21 : vector<8x128xf32>
    %23 = arith.truncf %22 : vector<8x128xf32> to vector<8x128xbf16>
    %c0_11 = arith.constant 0 : index
    %c0_12 = arith.constant 0 : index
    %24 = vector.load %arg6[%c0_11, %c0_12] : memref<128x128xbf16, #tpu.memory_space<vmem>>, vector<128x128xbf16>
    %cst_13 = arith.constant dense<0.000000e+00> : vector<8x128xf32>
    %25 = tpu.matmul %23, %24, %cst_13 {dimension_numbers = #tpu.dot_dimension_numbers<[1], [0], [0], [1], [0, 0, 1, 1], [], []>} : vector<8x128xbf16>, vector<128x128xbf16>, vector<8x128xf32> -> vector<8x128xf32>
    %c0_14 = arith.constant 0 : index
    %c0_15 = arith.constant 0 : index
    %26 = vector.load %arg7[%c0_14, %c0_15] : memref<1x128xf32, #tpu.memory_space<vmem>>, vector<1x128xf32>
    %27 = vector.broadcast %26 : vector<1x128xf32> to vector<8x128xf32>
    %28 = arith.addf %25, %27 : vector<8x128xf32>
    %c0_16 = arith.constant 0 : index
    %c0_17 = arith.constant 0 : index
    %29 = vector.load %arg8[%c0_16, %c0_17] : memref<8x128xf32, #tpu.memory_space<vmem>>, vector<8x128xf32>
    tpu.vector_store %arg8[%c0_16, %c0_17], %28 {strides = array<i32>} : memref<8x128xf32, #tpu.memory_space<vmem>>, vector<8x128xf32>,
    return
  }
  func.func @transform_0(%arg0: i32) -> (i32, i32) {
    %c0_i32 = arith.constant 0 : i32
    %c0_i32_0 = arith.constant 0 : i32
    return %arg0, %c0_i32 : i32, i32
  }
  func.func @transform_1(%arg0: i32) -> (i32, i32) {
    %c0_i32 = arith.constant 0 : i32
    %c0_i32_0 = arith.constant 0 : i32
    %c0_i32_1 = arith.constant 0 : i32
    return %c0_i32, %c0_i32_0 : i32, i32
  }
  func.func @transform_2(%arg0: i32) -> (i32, i32) {
    %c0_i32 = arith.constant 0 : i32
    %c0_i32_0 = arith.constant 0 : i32
    %c0_i32_1 = arith.constant 0 : i32
    return %c0_i32, %c0_i32_0 : i32, i32
  }
  func.func @transform_3(%arg0: i32) -> (i32, i32) {
    %c0_i32 = arith.constant 0 : i32
    %c0_i32_0 = arith.constant 0 : i32
    %c0_i32_1 = arith.constant 0 : i32
    return %c0_i32, %c0_i32_0 : i32, i32
  }
  func.func @transform_4(%arg0: i32) -> (i32, i32) {
    %c0_i32 = arith.constant 0 : i32
    %c0_i32_0 = arith.constant 0 : i32
    %c0_i32_1 = arith.constant 0 : i32
    return %c0_i32, %c0_i32_0 : i32, i32
  }
  func.func @transform_5(%arg0: i32) -> (i32, i32) {
    %c0_i32 = arith.constant 0 : i32
    %c0_i32_0 = arith.constant 0 : i32
    %c0_i32_1 = arith.constant 0 : i32
    return %c0_i32, %c0_i32_0 : i32, i32
  }
  func.func @transform_6(%arg0: i32) -> (i32, i32) {
    %c0_i32 = arith.constant 0 : i32
    %c0_i32_0 = arith.constant 0 : i32
    %c0_i32_1 = arith.constant 0 : i32
    return %c0_i32, %c0_i32_0 : i32, i32
  }
  func.func @transform_7(%arg0: i32) -> (i32, i32) {
    %c0_i32 = arith.constant 0 : i32
    %c0_i32_0 = arith.constant 0 : i32
    return %arg0, %c0_i32 : i32, i32
  }
}

</mosaic_0001>

<bundles_post_ra>
// kernel: time_embedding_forward.1
= control target key start
LH: loop header
LB: loop body
LE: loop exit
PB: predicated region body
PF: predicated region fallthrough
CT: control target
= control target key end

     0   :  { %12 = vsyncpa [#allocation3], 0  ;;  %s810_s0 = inlined_call_operand.vmem [shape: f32[8,1], index: 0, kind: input, shape index: {}]   ;;  %s811_s1 = inlined_call_operand.vmem [shape: f32[1,16], index: 1, kind: input, shape index: {}]   ;;  %s812_s2 = inlined_call_operand.vmem [shape: bf16[16,128], index: 2, kind: input, shape index: {}]   ;;  %s813_s3 = inlined_call_operand.hbm [shape: bf16[16,128], index: 3, kind: input, shape index: {}]   ;;  %s814_s4 = inlined_call_operand.vmem [shape: f32[1,128], index: 4, kind: input, shape index: {}]   ;;  %s815_s5 = inlined_call_operand.hbm [shape: bf16[128,128], index: 5, kind: input, shape index: {}]   ;;  %s816_s6 = inlined_call_operand.vmem [shape: f32[1,128], index: 6, kind: input, shape index: {}]   ;;  %s817_s7 = inlined_call_operand.vmem [shape: f32[8,128], index: 7, kind: output, shape index: {}]  }
   0x1   :  { %s24_s26 = sshll.u32 %s813_s3, 4  ;;  %s25_s26 = int_to_ptr.hbm [resolvable:$true] %s24_s26 }
   0x2   :  { %13 = vsyncpa [#allocation5], 0  ;;  %s674_s27 = smov [#allocation2]   ;;  %s39_s8 = sshll.u32 %s815_s5, 4  ;;  %s40_s8 = int_to_ptr.hbm [resolvable:$true] %s39_s8 }
   0x3   :  { %s26_s28 = sshll.u32 %s674_s27, 4  ;;  %s675_s9 = smov 64   ;;  %s27_s28 = int_to_ptr.vmem [resolvable:$true] %s26_s28 }
   0x4   :  { %s676_s10 = smov 4   ;;  %s677_s11 = smov [#allocation4]  }
   0x5   :  { %32 = dma.hbm_to_vmem [thread:$0]  %s25_s26, 128, %s27_s28, [#allocation3], %s675_s9, %s675_s9, %s676_s10  }
   0x6   :  { %s41_s12 = sshll.u32 %s677_s11, 4  ;;  %s42_s12 = int_to_ptr.vmem [resolvable:$true] %s41_s12 }
   0x7   :  { %47 = dma.hbm_to_vmem [thread:$0]  %s40_s8, 1024, %s42_s12, [#allocation5], %s675_s9, %s675_s9, %s676_s10  }
   0x8   :  { %670 = dma.done.wait [#allocation3], 128  }
   0x9   :  { %671 = vsyncadd [#allocation3], 4294967168 }
   0xa   :  { %672 = dma.done.wait [#allocation5], 1024  }
   0xb   :  { %673 = vsyncadd [#allocation5], 4294966272  ;;  %v678_v0 = vmov 0   ;;  %v59_v1 = vld [vmem:[%s810_s0] sm:$0xff]  ;;  %v679_v18 = vmov 683565275  }
   0xc   :  { %614 = vset.pattern.permute.xlu0 %v678_v0  ;;  %v615_v2 = vld [vmem:[%s811_s1] ss:$0 sm:$0xff]  ;;  %v680_v20 = vmov 2475754826   ;;  %v681_v23 = vmov 2131351028  }
   0xd   :  { %63 = vperm.xlu0 %614, %v59_v1   ;;  %v594_v5 = vld [vmem:[#allocation2] sm:$0xff]  ;;  %v682_v26 = vmov 2102212464   ;;  %v683_v29 = vmov 920167782  }
   0xe   :  { %v593_v6 = vld [vmem:[%s812_s2] sm:$0xff]  ;;  %402 = vmatpush.bf16.msra.mxu0 %v594_v5  ;;  %v684_v32 = vmov 1326507024  }
   0xf   :  { %424 = vmatpush.bf16.msra.mxu1 %v593_v6 }
  0x7f   :  { %v64_v3 = vpop.permute.xlu0 %63 }
  0x80   :  { %v738_v4 = vmul.f32 %v615_v2, %v64_v3 }
  0x82   :  { %v73_v7 = vand.u32 2139095040, %v738_v4  ;;  %v70_v10 = vand.u32 2147483647, %v738_v4  ;;  %vm72_vm12 = vcmp.lt.s32.totalorder %v738_v4, 0 }
  0x84   :  { %v74_v8 = vshrl.u32 %v73_v7, 23  ;;  %v77_v12 = vand.u32 8388607, %v70_v10  ;;  %vm71_vm13 = vcmp.le.f32.partialorder %v70_v10, 0.7853982 }
  0x86   :  { %v544_v9 = vadd.s32 4294967169, %v74_v8  ;;  %v78_v16 = vor.u32 8388608, %v77_v12 }
  0x88   :  { %v80_v11 = vadd.s32 1, %v544_v9  ;;  %v758_v39 = vshll.u32 %v78_v16, 8 }
  0x8a   :  { %vm81_vm0 = vcmp.gt.s32.totalorder %v80_v11, 0  ;;  %v119_v48 = vand.u32 65535, %v758_v39  ;;  %v120_v49 = vshrl.u32 %v758_v39, 16 }
  0x8b   :  { %v82_v13 = vsel %vm81_vm0, %v80_v11, 0 }
  0x8c   :  { %v84_v14 = vand.u32 31, %v82_v13  ;;  %v749_v17 = vshrl.u32 %v82_v13, 5 }
  0x8e   :  { %v747_v15 = vsub.s32 32, %v84_v14  ;;  %v87_v19 = vshll.u32 %v679_v18, %v84_v14  ;;  %v90_v21 = vshll.u32 %v680_v20, %v84_v14  ;;  %v93_v25 = vshll.u32 %v681_v23, %v84_v14 }
  0x8f   :  { %v96_v28 = vshll.u32 %v682_v26, %v84_v14  ;;  %v99_v31 = vshll.u32 %v683_v29, %v84_v14  ;;  %vm102_vm1 = vcmp.lt.s32.totalorder %v749_v17, 1  ;;  %vm105_vm2 = vcmp.lt.s32.totalorder %v749_v17, 4 }
  0x90   :  { %v88_v22 = vshrl.u32 %v680_v20, %v747_v15  ;;  %v91_v24 = vshrl.u32 %v681_v23, %v747_v15  ;;  %v94_v27 = vshrl.u32 %v682_v26, %v747_v15  ;;  %v97_v30 = vshrl.u32 %v683_v29, %v747_v15 }
  0x91   :  { %v100_v33 = vshrl.u32 %v684_v32, %v747_v15  ;;  %vm104_vm3 = vcmp.lt.s32.totalorder %v749_v17, 3  ;;  %vm103_vm4 = vcmp.lt.s32.totalorder %v749_v17, 2  ;;  %v86_v13 = vshrl.u32 %v679_v18, %v747_v15 }
  0x92   :  { %v89_v34 = vor.u32 %v88_v22, %v87_v19  ;;  %v92_v35 = vor.u32 %v91_v24, %v90_v21  ;;  %v95_v36 = vor.u32 %v94_v27, %v93_v25  ;;  %v98_v37 = vor.u32 %v97_v30, %v96_v28 }
  0x93   :  { %v101_v38 = vor.u32 %v100_v33, %v99_v31 }
  0x94   :  { %v110_v40 = vsel %vm102_vm1, %v89_v34, %v92_v35  ;;  %v114_v41 = vsel %vm102_vm1, %v92_v35, %v95_v36  ;;  %v111_v42 = vsel %vm105_vm2, %v98_v37, 920167782  ;;  %v107_v9 = vsel %vm105_vm2, %v95_v36, 2102212464 }
  0x95   :  { %v115_v43 = vsel %vm105_vm2, %v101_v38, 1326507024  ;;  %v112_v44 = vsel %vm104_vm3, %v95_v36, %v111_v42  ;;  %v106_v22 = vsel %vm102_vm1, %v86_v13, %v89_v34  ;;  %v108_v23 = vsel %vm104_vm3, %v92_v35, %v107_v9 }
  0x96   :  { %v116_v45 = vsel %vm104_vm3, %v98_v37, %v115_v43  ;;  %v113_v46 = vsel %vm103_vm4, %v110_v40, %v112_v44  ;;  %v109_v15 = vsel %vm103_vm4, %v106_v22, %v108_v23 }
  0x97   :  { %v117_v47 = vsel %vm103_vm4, %v114_v41, %v116_v45  ;;  %v143_v52 = vand.u32 65535, %v113_v46  ;;  %v144_v53 = vshrl.u32 %v113_v46, 16  ;;  %v163_v30 = vmul.u32 %v758_v39, %v109_v15  ;;  %v601_v15 = vld [vmem:[#allocation4 + $0x30] sm:$0xff] }
  0x98   :  { %v121_v50 = vand.u32 65535, %v117_v47  ;;  %v122_v51 = vshrl.u32 %v117_v47, 16  ;;  %vm213_vm4 = vweird.f32 %v738_v4 }
  0x99   :  { %v146_v56 = vmul.u32 %v144_v53, %v119_v48  ;;  %v147_v57 = vmul.u32 %v143_v52, %v120_v49  ;;  %v145_v61 = vmul.u32 %v143_v52, %v119_v48  ;;  %v148_v2 = vmul.u32 %v144_v53, %v120_v49 }
  0x9a   :  { %v124_v54 = vmul.u32 %v122_v51, %v119_v48  ;;  %v125_v55 = vmul.u32 %v121_v50, %v120_v49  ;;  %v123_v58 = vmul.u32 %v121_v50, %v119_v48  ;;  %v126_v60 = vmul.u32 %v122_v51, %v120_v49 }
  0x9b   :  { %v149_v62 = vshll.u32 %v146_v56, 16  ;;  %v151_v5 = vshll.u32 %v147_v57, 16  ;;  %v150_v20 = vshrl.u32 %v146_v56, 16  ;;  %v152_v26 = vshrl.u32 %v147_v57, 16 }
  0x9c   :  { %v127_v59 = vshll.u32 %v124_v54, 16  ;;  %v129_v63 = vshll.u32 %v125_v55, 16  ;;  %v128_v14 = vshrl.u32 %v124_v54, 16  ;;  %v130_v24 = vshrl.u32 %v125_v55, 16 }
  0x9d   :  { %vm153_vm6 = vc.u32 %v145_v61, %v149_v62  ;;  %v155_v6 = vadd.s32 %v149_v62, %v145_v61 }
  0x9e   :  { %vm131_vm5 = vc.u32 %v123_v58, %v127_v59  ;;  %v133_v1 = vadd.s32 %v127_v59, %v123_v58  ;;  %v154_v8 = vsel %vm153_vm6, 1, %v678_v0 }
  0x9f   :  { %v132_v3 = vsel %vm131_vm5, 1, %v678_v0  ;;  %v156_v12 = vadd.s32 %v154_v8, %v148_v2  ;;  %vm157_vm8 = vc.u32 %v155_v6, %v151_v5  ;;  %v159_v29 = vadd.s32 %v155_v6, %v151_v5 }
  0xa0   :  { %v134_v7 = vadd.s32 %v132_v3, %v126_v60  ;;  %vm135_vm7 = vc.u32 %v133_v1, %v129_v63  ;;  %v158_v19 = vsel %vm157_vm8, 1, %v678_v0  ;;  %vm391_vm5 = vcmask 130048  }
  0xa1   :  { %v136_v11 = vsel %vm135_vm7, 1, %v678_v0  ;;  %v160_v21 = vadd.s32 %v158_v19, %v156_v12 }
  0xa2   :  { %v138_v16 = vadd.s32 %v136_v11, %v134_v7 }
  0xa3   :  { %v161_v27 = vadd.s32 %v160_v21, %v150_v20 }
  0xa4   :  { %v139_v25 = vadd.s32 %v138_v16, %v128_v14 }
  0xa5   :  { %v162_v18 = vadd.s32 %v161_v27, %v152_v26 }
  0xa6   :  { %v140_v28 = vadd.s32 %v139_v25, %v130_v24 }
  0xa7   :  { %v166_v0 = vadd.s32 1, %v162_v18 }
  0xa8   :  { %vm165_vm9 = vc.u32 %v140_v28, %v159_v29  ;;  %v164_v17 = vadd.s32 %v159_v29, %v140_v28  ;;  %v602_v29 = vld [vmem:[#allocation4 + $0x38] sm:$0xff] }
  0xa9   :  { %v167_v31 = vsel %vm165_vm9, %v166_v0, %v162_v18  ;;  %524 = vmatpush.bf16.msra.mxu2 %v602_v29  ;;  %v600_v18 = vld [vmem:[#allocation4 + $0x28] sm:$0xff]  ;;  %v599_v0 = vld [vmem:[#allocation4 + $0x20] sm:$0xff] }
  0xaa   :  { %v168_v32 = vadd.s32 %v167_v31, %v163_v30  ;;  %v598_v30 = vld [vmem:[#allocation4 + $0x18] sm:$0xff]  ;;  %v596_v31 = vld [vmem:[#allocation4 + $0x8] sm:$0xff] }
  0xac   :  { %v169_v33 = vadd.s32 536870912, %v168_v32 }
  0xad   :  { %525 = vmatpush.bf16.msra.mxu2 %v601_v15 }
  0xae   :  { %v170_v34 = vshrl.u32 %v169_v33, 30  ;;  %v595_v33 = vld [vmem:[#allocation4] sm:$0xff] }
  0xb0   :  { %v171_v36 = vshll.u32 %v170_v34, 30  ;;  %v194_v55 = vsub.s32 4, %v170_v34 }
  0xb1   :  { %526 = vmatpush.bf16.msra.mxu2 %v600_v18 }
  0xb2   :  { %v172_v35 = vsub.s32 %v168_v32, %v171_v36  ;;  %v195_v60 = vsel %vm72_vm12, %v194_v55, %v170_v34  ;;  %v616_v32 = vld [vmem:[%s814_s4] ss:$0 sm:$0xff] }
  0xb3   :  { %v197_v63 = vsel %vm71_vm13, 0, %v195_v60 }
  0xb4   :  { %vm173_vm10 = vcmp.lt.s32.totalorder %v172_v35, 0  ;;  %v174_v37 = vsub.s32 0, %v172_v35  ;;  %v214_v6 = vadd.s32 3, %v197_v63  ;;  %v369_v11 = vand.u32 3, %v197_v63 }
  0xb5   :  { %527 = vmatpush.bf16.msra.mxu2 %v599_v0 }
  0xb6   :  { %v175_v38 = vsel %vm173_vm10, %v174_v37, %v172_v35  ;;  %v215_v12 = vand.u32 3, %v214_v6  ;;  %vm370_vm14 = vcmp.lt.s32.totalorder %v369_v11, 2  ;;  %vm371_vm15 = vcmp.eq.s32.totalorder %v369_v11, 0 }
  0xb7   :  { %v176_v40 = vclz %v175_v38  ;;  %vm374_vm0 = vcmp.eq.s32.totalorder %v369_v11, 2 }
  0xb8   :  { %vm216_vm1 = vcmp.lt.s32.totalorder %v215_v12, 2  ;;  %vm217_vm2 = vcmp.eq.s32.totalorder %v215_v12, 0  ;;  %vm220_vm3 = vcmp.eq.s32.totalorder %v215_v12, 2 }
  0xb9   :  { %v545_v41 = vadd.s32 4294967294, %v176_v40  ;;  %528 = vmatpush.bf16.msra.mxu2 %v598_v30 }
  0xbb   :  { %vm546_vm11 = vcmp.lt.s32.totalorder %v545_v41, 0 }
  0xbc   :  { %v179_v42 = vsel %vm546_vm11, 0, %v545_v41 }
  0xbd   :  { %v180_v43 = vsub.s32 32, %v179_v42  ;;  %v184_v44 = vsub.s32 4294967266, %v179_v42  ;;  %v181_v45 = vshll.u32 %v172_v35, %v179_v42 }
  0xbf   :  { %v182_v46 = vshrl.u32 %v164_v17, %v180_v43  ;;  %v185_v47 = vadd.s32 127, %v184_v44 }
  0xc1   :  { %v183_v39 = vor.u32 %v182_v46, %v181_v45  ;;  %v186_v48 = vshll.u32 %v185_v47, 23 }
  0xc3   :  { %v187_v49 = vor.u32 4788187, %v186_v48  ;;  %v190_v51 = vcvt.s32.f32 %v183_v39 }
  0xc5   :  { %v188_v50 = vand.u32 2147483647, %v187_v49 }
  0xc7   :  { %v191_v52 = vmul.f32 %v190_v51, %v188_v50 }
  0xc9   :  { %v192_v53 = vxor.u32 2147483648, %v191_v52 }
  0xcb   :  { %v193_v54 = vsel %vm72_vm12, %v192_v53, %v191_v52 }
  0xcc   :  { %v196_v56 = vsel %vm71_vm13, %v738_v4, %v193_v54  ;;  %v597_v4 = vld [vmem:[#allocation4 + $0x10] sm:$0xff]  ;;  %v617_v54 = vld [vmem:[%s816_s6] ss:$0 sm:$0xff] }
  0xcd   :  { %v198_v57 = vmul.f32 %v196_v56, %v196_v56  ;;  %529 = vmatpush.bf16.msra.mxu2 %v597_v4 }
  0xcf   :  { %v199_v58 = vmul.f32 -0.001358992, %v198_v57  ;;  %v206_v59 = vmul.f32 -0.00019511016, %v198_v57 }
  0xd1   :  { %v200_v61 = vadd.f32 0.041655596, %v199_v58  ;;  %v207_v62 = vadd.f32 0.008332121, %v206_v59  ;;  %530 = vmatpush.bf16.msra.mxu2 %v596_v31 }
  0xd3   :  { %v201_v1 = vmul.f32 %v200_v61, %v198_v57  ;;  %v208_v2 = vmul.f32 %v207_v62, %v198_v57 }
  0xd5   :  { %v202_v3 = vadd.f32 -0.4999988, %v201_v1  ;;  %v209_v5 = vadd.f32 -0.16666654, %v208_v2  ;;  %531 = vmatpush.bf16.msra.mxu2 %v595_v33 }
  0xd7   :  { %v203_v7 = vmul.f32 %v202_v3, %v198_v57  ;;  %v210_v8 = vmul.f32 %v209_v5, %v198_v57 }
  0xd9   :  { %v204_v9 = vadd.f32 1.0, %v203_v7  ;;  %v211_v10 = vadd.f32 1.0, %v210_v8 }
  0xdb   :  { %v212_v13 = vmul.f32 %v211_v10, %v196_v56  ;;  %v221_v14 = vxor.u32 2147483648, %v204_v9 }
  0xdd   :  { %v218_v16 = vxor.u32 2147483648, %v212_v13  ;;  %v376_v20 = vsel %vm374_vm0, %v221_v14, %v212_v13  ;;  %v222_v22 = vsel %vm220_vm3, %v221_v14, %v212_v13 }
  0xdf   :  { %v373_v19 = vsel %vm371_vm15, %v204_v9, %v218_v16  ;;  %v219_v21 = vsel %vm217_vm2, %v204_v9, %v218_v16 }
  0xe0   :  { %v377_v23 = vsel %vm370_vm14, %v373_v19, %v376_v20  ;;  %v223_v24 = vsel %vm216_vm1, %v219_v21, %v222_v22 }
  0xe1   :  { %v378_v25 = vsel %vm213_vm4, nan, %v377_v23  ;;  %v224_v26 = vsel %vm213_vm4, nan, %v223_v24 }
  0xe2   :  { %v382_v27 = vpack.c.bf16 %v378_v25, %v378_v25  ;;  %v379_v28 = vpack.c.bf16 %v224_v26, %v224_v26 }
  0xe4   :  { %554 = vmatmul.msk.bf16.vlgmr.msra.gmra.mxu0 %vm391_vm5, %v382_v27  ;;  %559 = vmatmul.msk.bf16.vlgmr.msra.gmra.mxu1 %vm391_vm5, %v379_v28 }
 0x161   :  { %v404_v34 = vpop.f32.mrf.mxu0  ;;  %v426_v36 = vpop.f32.mrf.mxu1 }
 0x162   :  { %v427_v35 = vadd.f32 %v426_v36, %v404_v34 }
 0x164   :  { %v434_v37 = vadd.f32 %v616_v32, %v427_v35 }
 0x166   :  { %v560_v38 = vmul.f32 -1.442695, %v434_v37 }
 0x168   :  { %618 = vpow2.f32 %v560_v38 }
 0x169   :  { %v406_v40 = vpop.f32.mrf.mxu0  ;;  %v428_v41 = vpop.f32.mrf.mxu1 }
 0x16e   :  { %v619_v42 = vpop.eup %618 }
 0x16f   :  { %v438_v17 = vadd.f32 1.0, %v619_v42 }
 0x171   :  { %620 = vrcp.f32 %v438_v17  ;;  %v450_v46 = vand.u32 2147483648, %v438_v17  ;;  %v448_v39 = vand.u32 2147483647, %v438_v17  ;;  %vm444_vm7 = vweird.f32 %v438_v17 }
 0x173   :  { %v451_v49 = vor.u32 1.1754944e-38, %v450_v46  ;;  %vm449_vm9 = vcmp.eq.f32.partialorder %v448_v39, 8.507059e+37 }
 0x177   :  { %v621_v43 = vpop.eup %620 }
 0x178   :  { %v440_v44 = vmul.f32 %v621_v43, %v438_v17  ;;  %vm445_vm6 = vweird.f32 %v621_v43 }
 0x179   :  { %vm446_vm8 = vmor %vm444_vm7, %vm445_vm6 }
 0x17a   :  { %v441_v45 = vsub.f32 1.0, %v440_v44 }
 0x17c   :  { %v442_v47 = vmul.f32 %v621_v43, %v441_v45 }
 0x17e   :  { %v443_v48 = vadd.f32 %v621_v43, %v442_v47 }
 0x180   :  { %v447_v50 = vsel %vm446_vm8, %v621_v43, %v443_v48 }
 0x181   :  { %v452_v51 = vsel %vm449_vm9, %v451_v49, %v447_v50 }
 0x182   :  { %v454_v52 = vmul.f32 %v452_v51, %v434_v37 }
 0x184   :  { %v455_v53 = vpack.c.bf16 %v454_v52, %v454_v52 }
 0x186   :  { %532 = vmatmul.bf16.vlgmr.msra.gmra.mxu2 %v455_v53 }
 0x209   :  { %v533_v55 = vpop.f32.mrf.mxu2 }
 0x20a   :  { %v534_v56 = vadd.f32 %v617_v54, %v533_v55 }
 0x20c   :  { %537 = vst [vmem:[%s817_s7] sm:$0xff] %v534_v56 }
 0x211   :  { %v535_v57 = vpop.f32.mrf.mxu2 }
 0x212   :  { %542 = vsyncpa [#allocation3], 1 }
 0x213   :  { %543 = vsyncpa [#allocation5], 1 }

</bundles_post_ra>
